<compile_context>
chip_gen: v7x
topology: tpu7x:2x2x1
jax: 0.10.0
libtpu: 0.0.40
codegen_flags: <defaults>
</compile_context>

<pallas_src>
import heapq
import numpy as np

import jax
import jax.numpy as jnp
from jax.experimental import pallas as pl
from jax.experimental.pallas import tpu as pltpu

_MAX_V_CHUNK = 1024        # vocab-axis chunk bound (multiple of 128)
_MAX_TILE_B = 256          # batch tile upper bound


def _round_up(x, m):
    return ((x + m - 1) // m) * m


def _pad_inner_dim(n_inner, max_v_chunk=_MAX_V_CHUNK):
    """Padded inner-node count: lane multiple, and chunkable by max_v_chunk."""
    vp = _round_up(n_inner, 128)
    if vp > max_v_chunk:
        vp = _round_up(vp, max_v_chunk)
    return vp


# ----------------------------- Pallas kernel --------------------------------
def _hsoftmax_kernel(emb_ref, inner_t_ref, code_ref, out_ref):
    # emb_ref     : (TB, D)  bf16  batch tile of input embeddings (resident over v)
    # inner_t_ref : (D, VC)  bf16  pre-transposed inner-node vectors, one V chunk
    # code_ref    : (TB, VC) int8  signed Huffman codes {+1,-1,0}
    # out_ref     : (1, TB)  f32   per-sample NLL, accumulated over V chunks
    emb = emb_ref[...]
    inner_t = inner_t_ref[...]
    code = code_ref[...].astype(jnp.float32)

    # scores[b, v] = <emb_b, inner_v> : natural (M,K)@(K,N) layout, f32 accumulate.
    scores = jax.lax.dot_general(
        emb, inner_t,
        dimension_numbers=(((1,), (0,)), ((), ())),
        preferred_element_type=jnp.float32)                    # (TB, VC)

    z = code * scores
    # -log sigmoid(z) = softplus(-z) = max(-z, 0) + log1p(exp(-|z|))
    softplus_neg = jnp.maximum(-z, 0.0) + jnp.log1p(jnp.exp(-jnp.abs(z)))
    # |code| in {0,1} folds the off-path mask straight into the reduction.
    partial_nll = jnp.sum(jnp.abs(code) * softplus_neg, axis=-1)   # (TB,)

    @pl.when(pl.program_id(1) == 0)
    def _():
        out_ref[...] = jnp.zeros_like(out_ref)

    out_ref[...] += partial_nll[None, :].astype(out_ref.dtype)


# ------------------------------- wrapper -------------------------------------
def _choose_batch_tiles(batch, max_tile_b=_MAX_TILE_B, split_threshold=64):
    if batch <= split_threshold:
        tb = _round_up(batch, 16)          # bf16 sublane pack
    else:
        # aim for >= 2 tiles so v7x's two TensorCores both get work
        tb = min(max_tile_b, _round_up(pl.cdiv(batch, 2), 16))
    bp = _round_up(batch, tb)
    return tb, bp, bp // tb


def _vmem_limit_bytes(tb, d, vc, inner_buffers):
    """Budget-derived scoped-VMEM limit (tile buffers + f32 temporaries)."""
    emb_bytes = tb * d * 2 * 2                    # bf16, double buffered
    inner_bytes = d * vc * 2 * inner_buffers      # bf16
    code_bytes = tb * vc * 1 * 2                  # int8, double buffered
    out_bytes = tb * 4 * 2                        # f32
    temp_bytes = 4 * tb * vc * 4                  # scores/z/softplus/contrib slabs
    need = emb_bytes + inner_bytes + code_bytes + out_bytes + temp_bytes
    try:
        cap = int(pltpu.get_tpu_info().vmem_capacity_bytes)
    except Exception:
        cap = 64 * 1024 * 1024                    # conservative: v7x physical VMEM
    return int(min(max(2 * need + (8 << 20), 32 << 20), int(cap * 0.85)))


def hierarchical_softmax_loss(emb, inner_t, code, *,
                              max_tile_b=_MAX_TILE_B, max_v_chunk=_MAX_V_CHUNK):
    """emb: (B, D) float; inner_t: (D, Vp) bf16 pre-transposed (Vp % 128 == 0);
    code: (B, Vp) int8 signed Huffman codes.  Returns per-sample NLL (B, 1) f32."""
    B, D = emb.shape
    d_w, Vp = inner_t.shape
    assert d_w == D and code.shape == (B, Vp)

    vc = min(max_v_chunk, Vp)
    assert Vp % vc == 0
    nv = Vp // vc

    tb, bp, g = _choose_batch_tiles(B, max_tile_b)

    # Only the gathered per-batch rows are padded per call (vocab-axis padding of
    # the inner table / code matrix is hoisted to model init).
    emb_p = jnp.pad(emb.astype(jnp.bfloat16), ((0, bp - B), (0, 0)))
    code_p = jnp.pad(code.astype(jnp.int8), ((0, bp - B), (0, 0)))

    cost = pl.CostEstimate(
        flops=2 * bp * Vp * D,
        transcendentals=2 * bp * Vp,
        bytes_accessed=bp * D * 2 + g * D * Vp * 2 + bp * Vp + g * tb * 4)

    def _call(inner_buffers):
        if inner_buffers == 1:
            inner_spec = pl.BlockSpec((D, vc), lambda i, v: (0, v),
                                      pipeline_mode=pl.Buffered(1))
        else:
            inner_spec = pl.BlockSpec((D, vc), lambda i, v: (0, v))
        return pl.pallas_call(
            _hsoftmax_kernel,
            out_shape=jax.ShapeDtypeStruct((g, tb), jnp.float32),
            grid=(g, nv),
            in_specs=[
                pl.BlockSpec((tb, D), lambda i, v: (i, 0)),    # emb tile
                inner_spec,                                    # inner chunk
                pl.BlockSpec((tb, vc), lambda i, v: (i, v)),   # signed codes
            ],
            out_specs=pl.BlockSpec((1, tb), lambda i, v: (i, 0)),
            compiler_params=pltpu.CompilerParams(
                dimension_semantics=("parallel", "arbitrary"),
                vmem_limit_bytes=_vmem_limit_bytes(tb, D, vc, inner_buffers)),
            cost_estimate=cost,
        )(emb_p, inner_t, code_p)

    if nv == 1:
        # Inner table is never re-fetched -> single-buffer it (halves its VMEM
        # footprint; matters on v7x's 64 MiB VMEM).  Fall back to the default
        # double buffering if this jax version rejects Buffered(1).
        try:
            out = _call(1)
        except Exception:
            out = _call(2)
    else:
        out = _call(2)

    return out.reshape(bp)[:B].reshape(B, 1)


# ------------------------- Huffman tree (glue, Python) ----------------------
def build_huffman_paths(frequencies):
    """Returns (path_idx (V, L) int32, path_code (V, L) f32 +-1, path_mask (V, L) f32)."""
    V = len(frequencies)
    heap = [(float(f), i, i) for i, f in enumerate(frequencies)]
    heapq.heapify(heap)
    parent, side = {}, {}
    next_id = V
    while len(heap) > 1:
        f0, _, a = heapq.heappop(heap)
        f1, _, b = heapq.heappop(heap)
        parent[a], side[a] = next_id, 0
        parent[b], side[b] = next_id, 1
        heapq.heappush(heap, (f0 + f1, next_id, next_id))
        next_id += 1
    root = heap[0][2] if heap else 0

    paths, codes = [], []
    for leaf in range(V):
        p, c = [], []
        node = leaf
        while node != root:
            p.append(parent[node] - V)           # inner-node index in [0, V-1)
            c.append(1.0 if side[node] == 1 else -1.0)
            node = parent[node]
        p.reverse(); c.reverse()
        paths.append(p); codes.append(c)

    L = max(1, max((len(p) for p in paths), default=1))
    path_idx = np.zeros((V, L), dtype=np.int32)
    path_code = np.ones((V, L), dtype=np.float32)
    path_mask = np.zeros((V, L), dtype=np.float32)
    for v in range(V):
        n = len(paths[v])
        path_idx[v, :n] = paths[v]
        path_code[v, :n] = codes[v]
        path_mask[v, :n] = 1.0
    return path_idx, path_code, path_mask


def build_dense_code(path_idx, path_code, path_mask, n_inner):
    """(V, n_inner) int8 matrix with +-1 on each word's Huffman path, 0 off-path."""
    V, L = path_idx.shape
    dense = np.zeros((V, n_inner), dtype=np.int8)
    for v in range(V):
        for l in range(L):
            if path_mask[v, l] > 0:
                dense[v, path_idx[v, l]] = np.int8(1 if path_code[v, l] > 0 else -1)
    return dense


# ------------------------------ SkipGram model ------------------------------
class SkipGramModelPallas:
    def __init__(self, vocab_size, embedding_dim, frequencies, key):
        k1, k2 = jax.random.split(key)
        # nn.Embedding default init ~ N(0, 1)
        self.embeddings = jax.random.normal(
            k1, (vocab_size, embedding_dim), dtype=jnp.float32)
        n_inner = max(1, vocab_size - 1)
        self.inner_vectors = 0.1 * jax.random.normal(
            k2, (n_inner, embedding_dim), dtype=jnp.float32)
        self.n_inner = n_inner

        pi, pc, pm = build_huffman_paths(frequencies)
        dense_code = build_dense_code(pi, pc, pm, n_inner)          # (V, n_inner)

        # --- hoisted per-model constants: padded/pre-transposed kernel inputs ---
        vp = _pad_inner_dim(n_inner)
        inner_t = jnp.zeros((embedding_dim, vp), jnp.bfloat16)
        self.inner_t_bf16 = inner_t.at[:, :n_inner].set(
            self.inner_vectors.T.astype(jnp.bfloat16))              # (D, Vp) bf16
        code_p = np.zeros((vocab_size, vp), np.int8)
        code_p[:, :n_inner] = dense_code
        self.dense_code_p = jnp.asarray(code_p)                     # (V, Vp) int8

    def forward(self, context, target):
        # glue: small gathers (embedding lookup + per-target signed-code rows)
        emb = self.embeddings[context]            # (B, D) f32
        code = self.dense_code_p[target]          # (B, Vp) int8 {+1,-1,0}
        # hot path: Pallas kernel -> per-sample negative log-likelihood (B, 1)
        return hierarchical_softmax_loss(emb, self.inner_t_bf16, code)

    def get_embeddings(self):
        return self.embeddings


# ------------------------- pure-JAX reference (check) ------------------------
def _reference_loss(emb, inner, code):
    scores = emb @ inner.T                        # (B, Vi) f32
    z = code * scores
    softplus_neg = jnp.maximum(-z, 0.0) + jnp.log1p(jnp.exp(-jnp.abs(z)))
    return jnp.sum(jnp.where(code == 0.0, 0.0, softplus_neg),
                   axis=-1, keepdims=True)


# ----------------------------------- main ------------------------------------
if __name__ == "__main__":
    vocab_size = 16
    embedding_dim = 32
    batch = 8

    # deterministic synthetic word frequencies
    frequencies = [float((i * 7) % 13 + 1) for i in range(vocab_size)]

    key = jax.random.PRNGKey(0)
    k_model, k_ctx, k_tgt = jax.random.split(key, 3)

    model = SkipGramModelPallas(vocab_size, embedding_dim, frequencies, k_model)

    context = jax.random.randint(k_ctx, (batch,), 0, vocab_size, dtype=jnp.int32)
    target = jax.random.randint(k_tgt, (batch,), 0, vocab_size, dtype=jnp.int32)

    loss = model.forward(context, target)
    jax.block_until_ready(loss)

    assert loss.shape == (batch, 1)
    assert bool(jnp.all(jnp.isfinite(loss)))

    # sanity check against a pure-JAX f32 reference (loose tol: bf16 streams)
    ref = _reference_loss(
        model.embeddings[context],
        model.inner_vectors,
        model.dense_code_p[target, :model.n_inner].astype(jnp.float32))
    assert bool(jnp.allclose(loss, ref, rtol=5e-2, atol=1e-2))

    print("KERNEL_OK")
</pallas_src>

<mosaic_0001>
module attributes {stable_mosaic.version = 11 : i64} {
  func.func @_hsoftmax_kernel(%arg0: i32, %arg1: i32, %arg2: memref<16x32xbf16, #tpu.memory_space<vmem>>, %arg3: memref<32x128xbf16, #tpu.memory_space<vmem>>, %arg4: memref<16x128xi8, #tpu.memory_space<vmem>>, %arg5: memref<1x16xf32, #tpu.memory_space<vmem>>) attributes {dimension_semantics = [#tpu.dimension_semantics<parallel>, #tpu.dimension_semantics<arbitrary>], iteration_bounds = array<i64: 1, 1>, scalar_prefetch = 0 : i64, scratch_operands = 0 : i64, tpu.core_type = #tpu.core_type<tc>, window_params = [{transform_indices = @transform_0, window_bounds = array<i64: 16, 32>}, {pipeline_mode = #tpu.pipeline_mode<synchronous>, transform_indices = @transform_1, window_bounds = array<i64: 32, 128>}, {transform_indices = @transform_2, window_bounds = array<i64: 16, 128>}, {transform_indices = @transform_3, window_bounds = array<i64: 1, 16>}]} {
    %c0 = arith.constant 0 : index
    %c0_0 = arith.constant 0 : index
    %0 = vector.load %arg2[%c0, %c0_0] : memref<16x32xbf16, #tpu.memory_space<vmem>>, vector<16x32xbf16>
    %c0_1 = arith.constant 0 : index
    %c0_2 = arith.constant 0 : index
    %1 = vector.load %arg3[%c0_1, %c0_2] : memref<32x128xbf16, #tpu.memory_space<vmem>>, vector<32x128xbf16>
    %c0_3 = arith.constant 0 : index
    %c0_4 = arith.constant 0 : index
    %2 = vector.load %arg4[%c0_3, %c0_4] : memref<16x128xi8, #tpu.memory_space<vmem>>, vector<16x128xi8>
    %3 = arith.sitofp %2 : vector<16x128xi8> to vector<16x128xf32>
    %cst = arith.constant dense<0.000000e+00> : vector<16x128xf32>
    %4 = tpu.matmul %0, %1, %cst {dimension_numbers = #tpu.dot_dimension_numbers<[1], [0], [0], [1], [0, 0, 1, 1], [], []>} : vector<16x32xbf16>, vector<32x128xbf16>, vector<16x128xf32> -> vector<16x128xf32>
    %5 = arith.mulf %3, %4 : vector<16x128xf32>
    %cst_5 = arith.constant 0.000000e+00 : f32
    %6 = vector.broadcast %cst_5 : f32 to vector<16x128xf32>
    %7 = arith.subf %6, %5 : vector<16x128xf32>
    %cst_6 = arith.constant 0.000000e+00 : f32
    %8 = vector.broadcast %cst_6 : f32 to vector<16x128xf32>
    %9 = arith.maximumf %7, %8 : vector<16x128xf32>
    %10 = math.absf %5 : vector<16x128xf32>
    %cst_7 = arith.constant 0.000000e+00 : f32
    %11 = vector.broadcast %cst_7 : f32 to vector<16x128xf32>
    %12 = arith.subf %11, %10 : vector<16x128xf32>
    %13 = math.exp %12 : vector<16x128xf32>
    %14 = math.log1p %13 : vector<16x128xf32>
    %15 = arith.addf %9, %14 : vector<16x128xf32>
    %16 = math.absf %3 : vector<16x128xf32>
    %17 = arith.mulf %16, %15 : vector<16x128xf32>
    %cst_8 = arith.constant dense<0.000000e+00> : vector<16xf32>
    %18 = vector.multi_reduction <add>, %17, %cst_8 [1] : vector<16x128xf32> to vector<16xf32>
    %c0_i32 = arith.constant 0 : i32
    %19 = arith.cmpi eq, %arg1, %c0_i32 : i32
    %20 = arith.extui %19 : i1 to i32
    %c0_i32_9 = arith.constant 0 : i32
    %21 = arith.cmpi ne, %20, %c0_i32_9 : i32
    scf.if %21 {
      %cst_14 = arith.constant 0.000000e+00 : f32
      %26 = vector.broadcast %cst_14 : f32 to vector<1x16xf32>
      %c0_15 = arith.constant 0 : index
      %c0_16 = arith.constant 0 : index
      %27 = vector.load %arg5[%c0_15, %c0_16] : memref<1x16xf32, #tpu.memory_space<vmem>>, vector<1x16xf32>
      tpu.vector_store %arg5[%c0_15, %c0_16], %26 {strides = array<i32>} : memref<1x16xf32, #tpu.memory_space<vmem>>, vector<1x16xf32>,
    } else {
    }
    %c0_10 = arith.constant 0 : index
    %c0_11 = arith.constant 0 : index
    %22 = vector.load %arg5[%c0_10, %c0_11] : memref<1x16xf32, #tpu.memory_space<vmem>>, vector<1x16xf32>
    %23 = vector.shape_cast %18 : vector<16xf32> to vector<1x16xf32>
    %24 = arith.addf %22, %23 : vector<1x16xf32>
    %c0_12 = arith.constant 0 : index
    %c0_13 = arith.constant 0 : index
    %25 = vector.load %arg5[%c0_12, %c0_13] : memref<1x16xf32, #tpu.memory_space<vmem>>, vector<1x16xf32>
    tpu.vector_store %arg5[%c0_12, %c0_13], %24 {strides = array<i32>} : memref<1x16xf32, #tpu.memory_space<vmem>>, vector<1x16xf32>,
    return
  }
  func.func @transform_0(%arg0: i32, %arg1: i32) -> (i32, i32) {
    %c0_i32 = arith.constant 0 : i32
    %c0_i32_0 = arith.constant 0 : i32
    return %arg0, %c0_i32 : i32, i32
  }
  func.func @transform_1(%arg0: i32, %arg1: i32) -> (i32, i32) {
    %c0_i32 = arith.constant 0 : i32
    %c0_i32_0 = arith.constant 0 : i32
    return %c0_i32, %arg1 : i32, i32
  }
  func.func @transform_2(%arg0: i32, %arg1: i32) -> (i32, i32) {
    %c0_i32 = arith.constant 0 : i32
    return %arg0, %arg1 : i32, i32
  }
  func.func @transform_3(%arg0: i32, %arg1: i32) -> (i32, i32) {
    %c0_i32 = arith.constant 0 : i32
    %c0_i32_0 = arith.constant 0 : i32
    return %arg0, %c0_i32 : i32, i32
  }
}

module attributes {stable_mosaic.version = 11 : i64} {
  func.func @_hsoftmax_kernel(%arg0: i32, %arg1: i32, %arg2: memref<16x32xbf16, #tpu.memory_space<vmem>>, %arg3: memref<32x128xbf16, #tpu.memory_space<vmem>>, %arg4: memref<16x128xi8, #tpu.memory_space<vmem>>, %arg5: memref<1x16xf32, #tpu.memory_space<vmem>>) attributes {dimension_semantics = [#tpu.dimension_semantics<parallel>, #tpu.dimension_semantics<arbitrary>], iteration_bounds = array<i64: 1, 1>, scalar_prefetch = 0 : i64, scratch_operands = 0 : i64, tpu.core_type = #tpu.core_type<tc>, window_params = [{transform_indices = @transform_0, window_bounds = array<i64: 16, 32>}, {transform_indices = @transform_1, window_bounds = array<i64: 32, 128>}, {transform_indices = @transform_2, window_bounds = array<i64: 16, 128>}, {transform_indices = @transform_3, window_bounds = array<i64: 1, 16>}]} {
    %c0 = arith.constant 0 : index
    %c0_0 = arith.constant 0 : index
    %0 = vector.load %arg2[%c0, %c0_0] : memref<16x32xbf16, #tpu.memory_space<vmem>>, vector<16x32xbf16>
    %c0_1 = arith.constant 0 : index
    %c0_2 = arith.constant 0 : index
    %1 = vector.load %arg3[%c0_1, %c0_2] : memref<32x128xbf16, #tpu.memory_space<vmem>>, vector<32x128xbf16>
    %c0_3 = arith.constant 0 : index
    %c0_4 = arith.constant 0 : index
    %2 = vector.load %arg4[%c0_3, %c0_4] : memref<16x128xi8, #tpu.memory_space<vmem>>, vector<16x128xi8>
    %3 = arith.sitofp %2 : vector<16x128xi8> to vector<16x128xf32>
    %cst = arith.constant dense<0.000000e+00> : vector<16x128xf32>
    %4 = tpu.matmul %0, %1, %cst {dimension_numbers = #tpu.dot_dimension_numbers<[1], [0], [0], [1], [0, 0, 1, 1], [], []>} : vector<16x32xbf16>, vector<32x128xbf16>, vector<16x128xf32> -> vector<16x128xf32>
    %5 = arith.mulf %3, %4 : vector<16x128xf32>
    %cst_5 = arith.constant 0.000000e+00 : f32
    %6 = vector.broadcast %cst_5 : f32 to vector<16x128xf32>
    %7 = arith.subf %6, %5 : vector<16x128xf32>
    %cst_6 = arith.constant 0.000000e+00 : f32
    %8 = vector.broadcast %cst_6 : f32 to vector<16x128xf32>
    %9 = arith.maximumf %7, %8 : vector<16x128xf32>
    %10 = math.absf %5 : vector<16x128xf32>
    %cst_7 = arith.constant 0.000000e+00 : f32
    %11 = vector.broadcast %cst_7 : f32 to vector<16x128xf32>
    %12 = arith.subf %11, %10 : vector<16x128xf32>
    %13 = math.exp %12 : vector<16x128xf32>
    %14 = math.log1p %13 : vector<16x128xf32>
    %15 = arith.addf %9, %14 : vector<16x128xf32>
    %16 = math.absf %3 : vector<16x128xf32>
    %17 = arith.mulf %16, %15 : vector<16x128xf32>
    %cst_8 = arith.constant dense<0.000000e+00> : vector<16xf32>
    %18 = vector.multi_reduction <add>, %17, %cst_8 [1] : vector<16x128xf32> to vector<16xf32>
    %c0_i32 = arith.constant 0 : i32
    %19 = arith.cmpi eq, %arg1, %c0_i32 : i32
    %20 = arith.extui %19 : i1 to i32
    %c0_i32_9 = arith.constant 0 : i32
    %21 = arith.cmpi ne, %20, %c0_i32_9 : i32
    scf.if %21 {
      %cst_14 = arith.constant 0.000000e+00 : f32
      %26 = vector.broadcast %cst_14 : f32 to vector<1x16xf32>
      %c0_15 = arith.constant 0 : index
      %c0_16 = arith.constant 0 : index
      %27 = vector.load %arg5[%c0_15, %c0_16] : memref<1x16xf32, #tpu.memory_space<vmem>>, vector<1x16xf32>
      tpu.vector_store %arg5[%c0_15, %c0_16], %26 {strides = array<i32>} : memref<1x16xf32, #tpu.memory_space<vmem>>, vector<1x16xf32>,
    } else {
    }
    %c0_10 = arith.constant 0 : index
    %c0_11 = arith.constant 0 : index
    %22 = vector.load %arg5[%c0_10, %c0_11] : memref<1x16xf32, #tpu.memory_space<vmem>>, vector<1x16xf32>
    %23 = vector.shape_cast %18 : vector<16xf32> to vector<1x16xf32>
    %24 = arith.addf %22, %23 : vector<1x16xf32>
    %c0_12 = arith.constant 0 : index
    %c0_13 = arith.constant 0 : index
    %25 = vector.load %arg5[%c0_12, %c0_13] : memref<1x16xf32, #tpu.memory_space<vmem>>, vector<1x16xf32>
    tpu.vector_store %arg5[%c0_12, %c0_13], %24 {strides = array<i32>} : memref<1x16xf32, #tpu.memory_space<vmem>>, vector<1x16xf32>,
    return
  }
  func.func @transform_0(%arg0: i32, %arg1: i32) -> (i32, i32) {
    %c0_i32 = arith.constant 0 : i32
    %c0_i32_0 = arith.constant 0 : i32
    return %arg0, %c0_i32 : i32, i32
  }
  func.func @transform_1(%arg0: i32, %arg1: i32) -> (i32, i32) {
    %c0_i32 = arith.constant 0 : i32
    %c0_i32_0 = arith.constant 0 : i32
    return %c0_i32, %arg1 : i32, i32
  }
  func.func @transform_2(%arg0: i32, %arg1: i32) -> (i32, i32) {
    %c0_i32 = arith.constant 0 : i32
    return %arg0, %arg1 : i32, i32
  }
  func.func @transform_3(%arg0: i32, %arg1: i32) -> (i32, i32) {
    %c0_i32 = arith.constant 0 : i32
    %c0_i32_0 = arith.constant 0 : i32
    return %arg0, %c0_i32 : i32, i32
  }
}

</mosaic_0001>

<bundles_post_ra>
// kernel: tpu_custom_call.1
= control target key start
LH: loop header
LB: loop body
LE: loop exit
PB: predicated region body
PF: predicated region fallthrough
CT: control target
= control target key end

     0   :  { %8 = vsyncpa [#allocation3], 0  ;;  %s580_s0 = inlined_call_operand.hbm [shape: bf16[16,32], index: 0, kind: input, shape index: {}]   ;;  %s581_s1 = inlined_call_operand.hbm [shape: bf16[32,128], index: 1, kind: input, shape index: {}]   ;;  %s582_s2 = inlined_call_operand.vmem [shape: s8[16,128], index: 2, kind: input, shape index: {}]   ;;  %s583_s3 = inlined_call_operand.hbm [shape: f32[1,16], index: 3, kind: output, shape index: {}]  }
   0x1   :  { %9 = vsyncpa [#allocation6], 0 }
   0x2   :  { %10 = vsyncpa [#allocation4], 0  ;;  %s497_s12 = smov [#allocation2]   ;;  %s425_s16 = scalar_lea.hbm %s580_s0, 128 }
   0x3   :  { %s16_s13 = sshll.u32 %s497_s12, 4  ;;  %p426_p0 = scmp.ne.s32.totalorder %s580_s0, %s425_s16  ;;  %s17_s13 = int_to_ptr.vmem [resolvable:$true] %s16_s13 }
   0x4   :  { %p429_p1 = scmp.lt.u32.totalorder %s425_s16, %s580_s0 }
   0x6   :  { %p431_p2 = pnand %p429_p1, %p426_p0 }
   0x8   :  { %434 = shalt.err (!%p431_p2)
}
   0x9   :  { %s435_s21 = scalar_lea.vmem %s17_s13, 128  ;;  %p440_p4 = scmp.lt.s32.totalorder %s17_s13, %s17_s13 }
   0xa   :  { %p436_p3 = scmp.ne.s32.totalorder %s17_s13, %s435_s21  ;;  %p441_p5 = scmp.lt.s32.totalorder %s435_s21, %s435_s21 }
   0xc   :  { %p442_p6 = por %p441_p5, %p440_p4 }
   0xe   :  { %p443_p7 = pnand %p442_p6, %p436_p3 }
  0x10   :  { %446 = shalt.err (!%p443_p7)
}
  0x11   :  { %s498_s22 = smov 64   ;;  %s499_s23 = smov 4  }
  0x12   :  { %22 = dma.hbm_to_vmem [thread:$0]  %s580_s0, 128, %s17_s13, [#allocation3], %s498_s22, %s498_s22, %s499_s23  }
  0x13   :  { %s500_s26 = smov [#allocation5]   ;;  %s447_s30 = scalar_lea.hbm %s581_s1, 256 }
  0x14   :  { %s28_s27 = sshll.u32 %s500_s26, 4  ;;  %p448_p8 = scmp.ne.s32.totalorder %s581_s1, %s447_s30  ;;  %s29_s27 = int_to_ptr.vmem [resolvable:$true] %s28_s27 }
  0x15   :  { %p451_p9 = scmp.lt.u32.totalorder %s447_s30, %s581_s1 }
  0x17   :  { %p453_p10 = pnand %p451_p9, %p448_p8 }
  0x19   :  { %456 = shalt.err (!%p453_p10)
}
  0x1a   :  { %s457_s8 = scalar_lea.vmem %s29_s27, 256  ;;  %p462_p12 = scmp.lt.s32.totalorder %s29_s27, %s29_s27 }
  0x1b   :  { %p458_p11 = scmp.ne.s32.totalorder %s29_s27, %s457_s8  ;;  %p463_p13 = scmp.lt.s32.totalorder %s457_s8, %s457_s8 }
  0x1d   :  { %p464_p0 = por %p463_p13, %p462_p12 }
  0x1f   :  { %p465_p1 = pnand %p464_p0, %p458_p11 }
  0x21   :  { %468 = shalt.err (!%p465_p1)
}
  0x22   :  { %34 = dma.hbm_to_vmem [thread:$0]  %s581_s1, 256, %s29_s27, [#allocation6], %s498_s22, %s498_s22, %s499_s23  }
  0x23   :  { %491 = dma.done.wait [#allocation3], 128  }
  0x24   :  { %492 = vsyncadd [#allocation3], 4294967168 }
  0x25   :  { %493 = dma.done.wait [#allocation6], 256  }
  0x26   :  { %494 = vsyncadd [#allocation6], 4294967040  ;;  %vm164_vm0 = vcmask 122880   ;;  %v501_v0 = vmov 0.0   ;;  %vm502_vm1 = vmmov 0   ;;  %v414_v1 = vld [vmem:[#allocation5] sm:$0xff]   ;;  %v169_v50 = vlaneseq }
  0x27   :  { %395 = vmatprep.subr.bf16.mxu0 %v501_v0  ;;  %165 = vst.msk [vmem:[#allocation7] sm:$0x1] %vm164_vm0, %v501_v0  ;;  %399 = vmatprep.mubr.msk.bf16.mxu0 %vm502_vm1, %v501_v0  ;;  %v415_v2 = vld [vmem:[#allocation5 + $0x8] sm:$0xff]   ;;  %v416_v3 = vld [vmem:[#allocation2] sm:$0xff]   ;;  %vm73_vm2 = vcmask 261120   ;;  %v503_v49 = vmov 0  }
  0x28   :  { %396 = vmatpush3.bf16.msra.mxu0 %v414_v1  ;;  %v389_v4 = vld [vmem:[%s582_s2] sm:$0xf]   ;;  %412 = vset.pattern.permute.xlu1 %v503_v49  ;;  %v504_v51 = vmov 1966171168   ;;  %v554_v53 = vshrl.u32 %v169_v50, 7  ;;  %vm348_vm5 = vcmask 130112  }
  0x29   :  { %397 = vmatprep.subr.bf16.mxu0 %v501_v0  ;;  %v390_v5 = vunpack.c.0.s8 %v389_v4  ;;  %v391_v6 = vunpack.c.1.s8 %v389_v4  ;;  %413 = vset.pattern.permute.xlu0 %v503_v49  ;;  %v238_v52 = vunpack.c.l.s4 %v504_v51  ;;  %s505_s2 = smov [#allocation7]  }
  0x2a   :  { %v171_v55 = vsub.s32 0, %v554_v53  ;;  %v175_v56 = vsub.s32 1, %v554_v53  ;;  %v179_v57 = vsub.s32 2, %v554_v53  ;;  %v183_v58 = vsub.s32 3, %v554_v53  ;;  %s374_s11 = sshll.u32 %s505_s2, 4  ;;  %s375_s11 = int_to_ptr.vmem [resolvable:$true] %s374_s11 }
  0x2b   :  { %v54_v7 = vcvt.s32.f32 %v390_v5  ;;  %v55_v8 = vcvt.s32.f32 %v391_v6  ;;  %v239_v54 = vunpack.c.0.s8 %v238_v52  ;;  %v187_v59 = vsub.s32 4, %v554_v53  ;;  %s469_s12 = scalar_lea.vmem %s375_s11, 16  ;;  %s473_s13 = scalar_lea.vmem %s375_s11, 32 }
  0x2c   :  { %398 = vmatpush3.bf16.msra.mxu0 %v415_v2  ;;  %v191_v60 = vsub.s32 5, %v554_v53  ;;  %v195_v61 = vsub.s32 6, %v554_v53  ;;  %v199_v62 = vsub.s32 7, %v554_v53  ;;  %p470_p2 = scmp.ne.s32.totalorder %s375_s11, %s469_s12  ;;  %p474_p3 = scmp.lt.s32.totalorder %s375_s11, %s375_s11 }
  0x2d   :  { %v152_v38 = vand.u32 2147483647, %v54_v7  ;;  %v153_v47 = vand.u32 2147483647, %v55_v8  ;;  %v242_v0 = vsub.s32 %v239_v54, %v554_v53  ;;  %p475_p4 = scmp.lt.s32.totalorder %s473_s13, %s469_s12 }
  0x2f   :  { %400 = vmatmul.mubr.msk.bf16.vlgmr.msra.gmra.mrb[0].mxu0 %vm73_vm2, %v416_v3  ;;  %p476_p5 = por %p475_p4, %p474_p3 }
  0x31   :  { %p477_p6 = pnand %p476_p5, %p470_p2 }
 0x102   :  { %v111_v9 = vpop.f32.mrb[0].mxu0 }
 0x103   :  { %v118_v10 = vmul.f32 %v111_v9, %v54_v7  ;;  %v401_v11 = vpop.f32.mrb[1].mxu0 }
 0x104   :  { %v114_v12 = vpop.f32.mrb[2].mxu0 }
 0x105   :  { %v124_v13 = vand.u32 2147483647, %v118_v10  ;;  %v119_v14 = vmul.f32 %v114_v12, %v55_v8  ;;  %v402_v15 = vpop.f32.mrb[3].mxu0  ;;  %v120_v28 = vsub.f32 0.0, %v118_v10 }
 0x107   :  { %v126_v16 = vsub.f32 0.0, %v124_v13  ;;  %v125_v17 = vand.u32 2147483647, %v119_v14  ;;  %v121_v32 = vsub.f32 0.0, %v119_v14  ;;  %v122_v37 = vmax.f32 %v120_v28, 0.0 }
 0x109   :  { %v128_v18 = vmul.f32 1.442695, %v126_v16  ;;  %v127_v19 = vsub.f32 0.0, %v125_v17  ;;  %v123_v42 = vmax.f32 %v121_v32, 0.0 }
 0x10b   :  { %417 = vpow2.f32 %v128_v18  ;;  %v130_v20 = vmul.f32 1.442695, %v127_v19 }
 0x10d   :  { %419 = vpow2.f32 %v130_v20 }
 0x115   :  { %v418_v21 = vpop.eup %417 }
 0x116   :  { %v132_v22 = vadd.f32 1.0, %v418_v21  ;;  %v135_v25 = vmul.f32 -0.5, %v418_v21  ;;  %v138_v29 = vand.u32 2147483647, %v418_v21 }
 0x117   :  { %v420_v23 = vpop.eup %419 }
 0x118   :  { %421 = vlog2.f32 %v132_v22  ;;  %v141_v24 = vadd.f32 1.0, %v420_v23  ;;  %v144_v26 = vmul.f32 -0.5, %v420_v23  ;;  %v136_v27 = vadd.f32 1.0, %v135_v25 }
 0x119   :  { %v147_v33 = vand.u32 2147483647, %v420_v23  ;;  %vm139_vm3 = vcmp.lt.f32.partialorder %v138_v29, 0.0004427343 }
 0x11a   :  { %423 = vlog2.f32 %v141_v24  ;;  %v145_v30 = vadd.f32 1.0, %v144_v26  ;;  %v137_v35 = vmul.f32 %v418_v21, %v136_v27 }
 0x11b   :  { %vm148_vm4 = vcmp.lt.f32.partialorder %v147_v33, 0.0004427343 }
 0x11c   :  { %v146_v41 = vmul.f32 %v420_v23, %v145_v30 }
 0x122   :  { %v422_v31 = vpop.eup %421 }
 0x123   :  { %v134_v34 = vmul.f32 0.6931472, %v422_v31 }
 0x124   :  { %v424_v36 = vpop.eup %423 }
 0x125   :  { %v140_v39 = vsel %vm139_vm3, %v137_v35, %v134_v34  ;;  %v143_v40 = vmul.f32 0.6931472, %v424_v36 }
 0x126   :  { %v150_v43 = vadd.f32 %v140_v39, %v122_v37 }
 0x127   :  { %v149_v44 = vsel %vm148_vm4, %v146_v41, %v143_v40 }
 0x128   :  { %v154_v45 = vmul.f32 %v152_v38, %v150_v43  ;;  %v151_v46 = vadd.f32 %v149_v44, %v123_v42  ;;  %v338_v44 = vand.u32 127, %v169_v50 }
 0x12a   :  { %156 = vadd.xlane.f32.xlu0 %v154_v45  ;;  %v155_v48 = vmul.f32 %v153_v47, %v151_v46  ;;  %v343_v45 = vadd.s32 4294967288, %v338_v44  ;;  %v341_v47 = vsub.s32 %v338_v44, %v554_v53 }
 0x12e   :  { %158 = vadd.xlane.f32.xlu0 %v155_v48  ;;  %v346_v48 = vsub.s32 %v343_v45, %v554_v53 }
 0x1b7   :  { %v157_v63 = vpop.xlane.xlu0 %156 }
 0x1b8   :  { %v172_v1 = vrot.slane %v157_v63, %v171_v55  ;;  %v176_v2 = vrot.slane %v157_v63, %v175_v56  ;;  %v180_v3 = vrot.slane %v157_v63, %v179_v57  ;;  %v184_v4 = vrot.slane %v157_v63, %v183_v58 }
 0x1b9   :  { %v188_v5 = vrot.slane %v157_v63, %v187_v59  ;;  %v192_v6 = vrot.slane %v157_v63, %v191_v60  ;;  %v196_v7 = vrot.slane %v157_v63, %v195_v61  ;;  %v200_v8 = vrot.slane %v157_v63, %v199_v62 }
 0x1ba   :  { %v233_v9 = vcombine.low %v172_v1, %v176_v2  ;;  %v234_v10 = vcombine.low %v180_v3, %v184_v4 }
 0x1bb   :  { %v159_v11 = vpop.xlane.xlu0 %158  ;;  %v235_v12 = vcombine.low %v188_v5, %v192_v6  ;;  %v236_v13 = vcombine.low %v196_v7, %v200_v8 }
 0x1bc   :  { %v243_v14 = vrot.slane %v233_v9, %v242_v0  ;;  %v250_v15 = vrot.slane %v234_v10, %v242_v0  ;;  %v204_v16 = vrot.slane %v159_v11, %v171_v55  ;;  %v208_v17 = vrot.slane %v159_v11, %v175_v56  ;;  %v166_v56 = vld [vmem:[#allocation7] sm:$0x1] }
 0x1bd   :  { %v257_v18 = vrot.slane %v235_v12, %v242_v0  ;;  %v264_v19 = vrot.slane %v236_v13, %v242_v0  ;;  %v212_v20 = vrot.slane %v159_v11, %v179_v57  ;;  %v216_v21 = vrot.slane %v159_v11, %v183_v58 }
 0x1be   :  { %v265_v22 = vcombine.low %v243_v14, %v250_v15  ;;  %v220_v23 = vrot.slane %v159_v11, %v187_v59  ;;  %v224_v24 = vrot.slane %v159_v11, %v191_v60  ;;  %v228_v25 = vrot.slane %v159_v11, %v195_v61 }
 0x1bf   :  { %v266_v26 = vcombine.low %v257_v18, %v264_v19  ;;  %v232_v27 = vrot.slane %v159_v11, %v199_v62  ;;  %v282_v28 = vcombine.low %v204_v16, %v208_v17  ;;  %v283_v29 = vcombine.low %v212_v20, %v216_v21 }
 0x1c0   :  { %v273_v30 = vrot.slane %v265_v22, %v242_v0  ;;  %v284_v31 = vcombine.low %v220_v23, %v224_v24 }
 0x1c1   :  { %v280_v32 = vrot.slane %v266_v26, %v242_v0  ;;  %v285_v33 = vcombine.low %v228_v25, %v232_v27  ;;  %v292_v34 = vrot.slane %v282_v28, %v242_v0  ;;  %v299_v35 = vrot.slane %v283_v29, %v242_v0 }
 0x1c2   :  { %v306_v36 = vrot.slane %v284_v31, %v242_v0 }
 0x1c3   :  { %v281_v37 = vcombine.low %v273_v30, %v280_v32  ;;  %v313_v38 = vrot.slane %v285_v33, %v242_v0  ;;  %v314_v39 = vcombine.low %v292_v34, %v299_v35 }
 0x1c5   :  { %332 = vperm.xlu1 %412, %v281_v37   ;;  %v315_v40 = vcombine.low %v306_v36, %v313_v38  ;;  %v322_v41 = vrot.slane %v314_v39, %v242_v0 }
 0x1c7   :  { %v329_v42 = vrot.slane %v315_v40, %v242_v0 }
 0x1c9   :  { %v330_v43 = vcombine.low %v322_v41, %v329_v42 }
 0x1cb   :  { %335 = vperm.xlu1 %412, %v330_v43  }
 0x244   :  { %v333_v46 = vpop.permute.xlu1 %332 }
 0x245   :  { %v342_v51 = vrot.slane %v333_v46, %v341_v47 }
 0x24a   :  { %v336_v49 = vpop.permute.xlu1 %335 }
 0x24b   :  { %v347_v52 = vrot.slane %v336_v49, %v346_v48 }
 0x24d   :  { %v349_v54 = vsel %vm348_vm5, %v347_v52, %v342_v51 }
 0x24e   :  { %v356_v55 = vrot.slane %v349_v54, %v242_v0 }
 0x250   :  { %v363_v57 = vrot.slane %v356_v55, %v242_v0 }
 0x252   :  { %v365_v58 = vadd.f32 %v363_v57, %v166_v56 }
 0x254   :  { %367 = vst.msk [vmem:[#allocation7] sm:$0x1] %vm164_vm0, %v365_v58 }
 0x255   :  { %480 = shalt.err (!%p477_p6)
}
 0x256   :  { %s481_s16 = scalar_lea.hbm %s583_s3, 16 }
 0x257   :  { %p482_p7 = scmp.ne.s32.totalorder %s583_s3, %s481_s16  ;;  %p485_p8 = scmp.lt.u32.totalorder %s481_s16, %s583_s3 }
 0x259   :  { %p487_p9 = pnand %p485_p8, %p482_p7 }
 0x25b   :  { %490 = shalt.err (!%p487_p9)
}
 0x25c   :  { %377 = dma.vmem_to_hbm [thread:$0]  %s375_s11, 16, %s583_s3, [#allocation4]  }
 0x25d   :  { %495 = dma.done.wait [#allocation4], 16  }
 0x25e   :  { %496 = vsyncadd [#allocation4], 4294967280 }
 0x25f   :  { %381 = vsyncpa [#allocation3], 1 }
 0x260   :  { %382 = vsyncpa [#allocation6], 1 }
 0x261   :  { %383 = vsyncpa [#allocation4], 1 }

// kernel: tpu_custom_call.1
= control target key start
LH: loop header
LB: loop body
LE: loop exit
PB: predicated region body
PF: predicated region fallthrough
CT: control target
= control target key end

     0   :  { %8 = vsyncpa [#allocation3], 0  ;;  %s580_s0 = inlined_call_operand.hbm [shape: bf16[16,32], index: 0, kind: input, shape index: {}]   ;;  %s581_s1 = inlined_call_operand.hbm [shape: bf16[32,128], index: 1, kind: input, shape index: {}]   ;;  %s582_s2 = inlined_call_operand.vmem [shape: s8[16,128], index: 2, kind: input, shape index: {}]   ;;  %s583_s3 = inlined_call_operand.hbm [shape: f32[1,16], index: 3, kind: output, shape index: {}]  }
   0x1   :  { %9 = vsyncpa [#allocation6], 0 }
   0x2   :  { %10 = vsyncpa [#allocation4], 0  ;;  %s497_s12 = smov [#allocation2]   ;;  %s425_s16 = scalar_lea.hbm %s580_s0, 128 }
   0x3   :  { %s16_s13 = sshll.u32 %s497_s12, 4  ;;  %p426_p0 = scmp.ne.s32.totalorder %s580_s0, %s425_s16  ;;  %s17_s13 = int_to_ptr.vmem [resolvable:$true] %s16_s13 }
   0x4   :  { %p429_p1 = scmp.lt.u32.totalorder %s425_s16, %s580_s0 }
   0x6   :  { %p431_p2 = pnand %p429_p1, %p426_p0 }
   0x8   :  { %434 = shalt.err (!%p431_p2)
}
   0x9   :  { %s435_s21 = scalar_lea.vmem %s17_s13, 128  ;;  %p440_p4 = scmp.lt.s32.totalorder %s17_s13, %s17_s13 }
   0xa   :  { %p436_p3 = scmp.ne.s32.totalorder %s17_s13, %s435_s21  ;;  %p441_p5 = scmp.lt.s32.totalorder %s435_s21, %s435_s21 }
   0xc   :  { %p442_p6 = por %p441_p5, %p440_p4 }
   0xe   :  { %p443_p7 = pnand %p442_p6, %p436_p3 }
  0x10   :  { %446 = shalt.err (!%p443_p7)
}
  0x11   :  { %s498_s22 = smov 64   ;;  %s499_s23 = smov 4  }
  0x12   :  { %22 = dma.hbm_to_vmem [thread:$0]  %s580_s0, 128, %s17_s13, [#allocation3], %s498_s22, %s498_s22, %s499_s23  }
  0x13   :  { %s500_s26 = smov [#allocation5]   ;;  %s447_s30 = scalar_lea.hbm %s581_s1, 256 }
  0x14   :  { %s28_s27 = sshll.u32 %s500_s26, 4  ;;  %p448_p8 = scmp.ne.s32.totalorder %s581_s1, %s447_s30  ;;  %s29_s27 = int_to_ptr.vmem [resolvable:$true] %s28_s27 }
  0x15   :  { %p451_p9 = scmp.lt.u32.totalorder %s447_s30, %s581_s1 }
  0x17   :  { %p453_p10 = pnand %p451_p9, %p448_p8 }
  0x19   :  { %456 = shalt.err (!%p453_p10)
}
  0x1a   :  { %s457_s8 = scalar_lea.vmem %s29_s27, 256  ;;  %p462_p12 = scmp.lt.s32.totalorder %s29_s27, %s29_s27 }
  0x1b   :  { %p458_p11 = scmp.ne.s32.totalorder %s29_s27, %s457_s8  ;;  %p463_p13 = scmp.lt.s32.totalorder %s457_s8, %s457_s8 }
  0x1d   :  { %p464_p0 = por %p463_p13, %p462_p12 }
  0x1f   :  { %p465_p1 = pnand %p464_p0, %p458_p11 }
  0x21   :  { %468 = shalt.err (!%p465_p1)
}
  0x22   :  { %34 = dma.hbm_to_vmem [thread:$0]  %s581_s1, 256, %s29_s27, [#allocation6], %s498_s22, %s498_s22, %s499_s23  }
  0x23   :  { %491 = dma.done.wait [#allocation3], 128  }
  0x24   :  { %492 = vsyncadd [#allocation3], 4294967168 }
  0x25   :  { %493 = dma.done.wait [#allocation6], 256  }
  0x26   :  { %494 = vsyncadd [#allocation6], 4294967040  ;;  %vm164_vm0 = vcmask 122880   ;;  %v501_v0 = vmov 0.0   ;;  %vm502_vm1 = vmmov 0   ;;  %v414_v1 = vld [vmem:[#allocation5] sm:$0xff]   ;;  %v169_v50 = vlaneseq }
  0x27   :  { %395 = vmatprep.subr.bf16.mxu0 %v501_v0  ;;  %165 = vst.msk [vmem:[#allocation7] sm:$0x1] %vm164_vm0, %v501_v0  ;;  %399 = vmatprep.mubr.msk.bf16.mxu0 %vm502_vm1, %v501_v0  ;;  %v415_v2 = vld [vmem:[#allocation5 + $0x8] sm:$0xff]   ;;  %v416_v3 = vld [vmem:[#allocation2] sm:$0xff]   ;;  %vm73_vm2 = vcmask 261120   ;;  %v503_v49 = vmov 0  }
  0x28   :  { %396 = vmatpush3.bf16.msra.mxu0 %v414_v1  ;;  %v389_v4 = vld [vmem:[%s582_s2] sm:$0xf]   ;;  %412 = vset.pattern.permute.xlu1 %v503_v49  ;;  %v504_v51 = vmov 1966171168   ;;  %v554_v53 = vshrl.u32 %v169_v50, 7  ;;  %vm348_vm5 = vcmask 130112  }
  0x29   :  { %397 = vmatprep.subr.bf16.mxu0 %v501_v0  ;;  %v390_v5 = vunpack.c.0.s8 %v389_v4  ;;  %v391_v6 = vunpack.c.1.s8 %v389_v4  ;;  %413 = vset.pattern.permute.xlu0 %v503_v49  ;;  %v238_v52 = vunpack.c.l.s4 %v504_v51  ;;  %s505_s2 = smov [#allocation7]  }
  0x2a   :  { %v171_v55 = vsub.s32 0, %v554_v53  ;;  %v175_v56 = vsub.s32 1, %v554_v53  ;;  %v179_v57 = vsub.s32 2, %v554_v53  ;;  %v183_v58 = vsub.s32 3, %v554_v53  ;;  %s374_s11 = sshll.u32 %s505_s2, 4  ;;  %s375_s11 = int_to_ptr.vmem [resolvable:$true] %s374_s11 }
  0x2b   :  { %v54_v7 = vcvt.s32.f32 %v390_v5  ;;  %v55_v8 = vcvt.s32.f32 %v391_v6  ;;  %v239_v54 = vunpack.c.0.s8 %v238_v52  ;;  %v187_v59 = vsub.s32 4, %v554_v53  ;;  %s469_s12 = scalar_lea.vmem %s375_s11, 16  ;;  %s473_s13 = scalar_lea.vmem %s375_s11, 32 }
  0x2c   :  { %398 = vmatpush3.bf16.msra.mxu0 %v415_v2  ;;  %v191_v60 = vsub.s32 5, %v554_v53  ;;  %v195_v61 = vsub.s32 6, %v554_v53  ;;  %v199_v62 = vsub.s32 7, %v554_v53  ;;  %p470_p2 = scmp.ne.s32.totalorder %s375_s11, %s469_s12  ;;  %p474_p3 = scmp.lt.s32.totalorder %s375_s11, %s375_s11 }
  0x2d   :  { %v152_v38 = vand.u32 2147483647, %v54_v7  ;;  %v153_v47 = vand.u32 2147483647, %v55_v8  ;;  %v242_v0 = vsub.s32 %v239_v54, %v554_v53  ;;  %p475_p4 = scmp.lt.s32.totalorder %s473_s13, %s469_s12 }
  0x2f   :  { %400 = vmatmul.mubr.msk.bf16.vlgmr.msra.gmra.mrb[0].mxu0 %vm73_vm2, %v416_v3  ;;  %p476_p5 = por %p475_p4, %p474_p3 }
  0x31   :  { %p477_p6 = pnand %p476_p5, %p470_p2 }
 0x102   :  { %v111_v9 = vpop.f32.mrb[0].mxu0 }
 0x103   :  { %v118_v10 = vmul.f32 %v111_v9, %v54_v7  ;;  %v401_v11 = vpop.f32.mrb[1].mxu0 }
 0x104   :  { %v114_v12 = vpop.f32.mrb[2].mxu0 }
 0x105   :  { %v124_v13 = vand.u32 2147483647, %v118_v10  ;;  %v119_v14 = vmul.f32 %v114_v12, %v55_v8  ;;  %v402_v15 = vpop.f32.mrb[3].mxu0  ;;  %v120_v28 = vsub.f32 0.0, %v118_v10 }
 0x107   :  { %v126_v16 = vsub.f32 0.0, %v124_v13  ;;  %v125_v17 = vand.u32 2147483647, %v119_v14  ;;  %v121_v32 = vsub.f32 0.0, %v119_v14  ;;  %v122_v37 = vmax.f32 %v120_v28, 0.0 }
 0x109   :  { %v128_v18 = vmul.f32 1.442695, %v126_v16  ;;  %v127_v19 = vsub.f32 0.0, %v125_v17  ;;  %v123_v42 = vmax.f32 %v121_v32, 0.0 }
 0x10b   :  { %417 = vpow2.f32 %v128_v18  ;;  %v130_v20 = vmul.f32 1.442695, %v127_v19 }
 0x10d   :  { %419 = vpow2.f32 %v130_v20 }
 0x115   :  { %v418_v21 = vpop.eup %417 }
 0x116   :  { %v132_v22 = vadd.f32 1.0, %v418_v21  ;;  %v135_v25 = vmul.f32 -0.5, %v418_v21  ;;  %v138_v29 = vand.u32 2147483647, %v418_v21 }
 0x117   :  { %v420_v23 = vpop.eup %419 }
 0x118   :  { %421 = vlog2.f32 %v132_v22  ;;  %v141_v24 = vadd.f32 1.0, %v420_v23  ;;  %v144_v26 = vmul.f32 -0.5, %v420_v23  ;;  %v136_v27 = vadd.f32 1.0, %v135_v25 }
 0x119   :  { %v147_v33 = vand.u32 2147483647, %v420_v23  ;;  %vm139_vm3 = vcmp.lt.f32.partialorder %v138_v29, 0.0004427343 }
 0x11a   :  { %423 = vlog2.f32 %v141_v24  ;;  %v145_v30 = vadd.f32 1.0, %v144_v26  ;;  %v137_v35 = vmul.f32 %v418_v21, %v136_v27 }
 0x11b   :  { %vm148_vm4 = vcmp.lt.f32.partialorder %v147_v33, 0.0004427343 }
 0x11c   :  { %v146_v41 = vmul.f32 %v420_v23, %v145_v30 }
 0x122   :  { %v422_v31 = vpop.eup %421 }
 0x123   :  { %v134_v34 = vmul.f32 0.6931472, %v422_v31 }
 0x124   :  { %v424_v36 = vpop.eup %423 }
 0x125   :  { %v140_v39 = vsel %vm139_vm3, %v137_v35, %v134_v34  ;;  %v143_v40 = vmul.f32 0.6931472, %v424_v36 }
 0x126   :  { %v150_v43 = vadd.f32 %v140_v39, %v122_v37 }
 0x127   :  { %v149_v44 = vsel %vm148_vm4, %v146_v41, %v143_v40 }
 0x128   :  { %v154_v45 = vmul.f32 %v152_v38, %v150_v43  ;;  %v151_v46 = vadd.f32 %v149_v44, %v123_v42  ;;  %v338_v44 = vand.u32 127, %v169_v50 }
 0x12a   :  { %156 = vadd.xlane.f32.xlu0 %v154_v45  ;;  %v155_v48 = vmul.f32 %v153_v47, %v151_v46  ;;  %v343_v45 = vadd.s32 4294967288, %v338_v44  ;;  %v341_v47 = vsub.s32 %v338_v44, %v554_v53 }
 0x12e   :  { %158 = vadd.xlane.f32.xlu0 %v155_v48  ;;  %v346_v48 = vsub.s32 %v343_v45, %v554_v53 }
 0x1b7   :  { %v157_v63 = vpop.xlane.xlu0 %156 }
 0x1b8   :  { %v172_v1 = vrot.slane %v157_v63, %v171_v55  ;;  %v176_v2 = vrot.slane %v157_v63, %v175_v56  ;;  %v180_v3 = vrot.slane %v157_v63, %v179_v57  ;;  %v184_v4 = vrot.slane %v157_v63, %v183_v58 }
 0x1b9   :  { %v188_v5 = vrot.slane %v157_v63, %v187_v59  ;;  %v192_v6 = vrot.slane %v157_v63, %v191_v60  ;;  %v196_v7 = vrot.slane %v157_v63, %v195_v61  ;;  %v200_v8 = vrot.slane %v157_v63, %v199_v62 }
 0x1ba   :  { %v233_v9 = vcombine.low %v172_v1, %v176_v2  ;;  %v234_v10 = vcombine.low %v180_v3, %v184_v4 }
 0x1bb   :  { %v159_v11 = vpop.xlane.xlu0 %158  ;;  %v235_v12 = vcombine.low %v188_v5, %v192_v6  ;;  %v236_v13 = vcombine.low %v196_v7, %v200_v8 }
 0x1bc   :  { %v243_v14 = vrot.slane %v233_v9, %v242_v0  ;;  %v250_v15 = vrot.slane %v234_v10, %v242_v0  ;;  %v204_v16 = vrot.slane %v159_v11, %v171_v55  ;;  %v208_v17 = vrot.slane %v159_v11, %v175_v56  ;;  %v166_v56 = vld [vmem:[#allocation7] sm:$0x1] }
 0x1bd   :  { %v257_v18 = vrot.slane %v235_v12, %v242_v0  ;;  %v264_v19 = vrot.slane %v236_v13, %v242_v0  ;;  %v212_v20 = vrot.slane %v159_v11, %v179_v57  ;;  %v216_v21 = vrot.slane %v159_v11, %v183_v58 }
 0x1be   :  { %v265_v22 = vcombine.low %v243_v14, %v250_v15  ;;  %v220_v23 = vrot.slane %v159_v11, %v187_v59  ;;  %v224_v24 = vrot.slane %v159_v11, %v191_v60  ;;  %v228_v25 = vrot.slane %v159_v11, %v195_v61 }
 0x1bf   :  { %v266_v26 = vcombine.low %v257_v18, %v264_v19  ;;  %v232_v27 = vrot.slane %v159_v11, %v199_v62  ;;  %v282_v28 = vcombine.low %v204_v16, %v208_v17  ;;  %v283_v29 = vcombine.low %v212_v20, %v216_v21 }
 0x1c0   :  { %v273_v30 = vrot.slane %v265_v22, %v242_v0  ;;  %v284_v31 = vcombine.low %v220_v23, %v224_v24 }
 0x1c1   :  { %v280_v32 = vrot.slane %v266_v26, %v242_v0  ;;  %v285_v33 = vcombine.low %v228_v25, %v232_v27  ;;  %v292_v34 = vrot.slane %v282_v28, %v242_v0  ;;  %v299_v35 = vrot.slane %v283_v29, %v242_v0 }
 0x1c2   :  { %v306_v36 = vrot.slane %v284_v31, %v242_v0 }
 0x1c3   :  { %v281_v37 = vcombine.low %v273_v30, %v280_v32  ;;  %v313_v38 = vrot.slane %v285_v33, %v242_v0  ;;  %v314_v39 = vcombine.low %v292_v34, %v299_v35 }
 0x1c5   :  { %332 = vperm.xlu1 %412, %v281_v37   ;;  %v315_v40 = vcombine.low %v306_v36, %v313_v38  ;;  %v322_v41 = vrot.slane %v314_v39, %v242_v0 }
 0x1c7   :  { %v329_v42 = vrot.slane %v315_v40, %v242_v0 }
 0x1c9   :  { %v330_v43 = vcombine.low %v322_v41, %v329_v42 }
 0x1cb   :  { %335 = vperm.xlu1 %412, %v330_v43  }
 0x244   :  { %v333_v46 = vpop.permute.xlu1 %332 }
 0x245   :  { %v342_v51 = vrot.slane %v333_v46, %v341_v47 }
 0x24a   :  { %v336_v49 = vpop.permute.xlu1 %335 }
 0x24b   :  { %v347_v52 = vrot.slane %v336_v49, %v346_v48 }
 0x24d   :  { %v349_v54 = vsel %vm348_vm5, %v347_v52, %v342_v51 }
 0x24e   :  { %v356_v55 = vrot.slane %v349_v54, %v242_v0 }
 0x250   :  { %v363_v57 = vrot.slane %v356_v55, %v242_v0 }
 0x252   :  { %v365_v58 = vadd.f32 %v363_v57, %v166_v56 }
 0x254   :  { %367 = vst.msk [vmem:[#allocation7] sm:$0x1] %vm164_vm0, %v365_v58 }
 0x255   :  { %480 = shalt.err (!%p477_p6)
}
 0x256   :  { %s481_s16 = scalar_lea.hbm %s583_s3, 16 }
 0x257   :  { %p482_p7 = scmp.ne.s32.totalorder %s583_s3, %s481_s16  ;;  %p485_p8 = scmp.lt.u32.totalorder %s481_s16, %s583_s3 }
 0x259   :  { %p487_p9 = pnand %p485_p8, %p482_p7 }
 0x25b   :  { %490 = shalt.err (!%p487_p9)
}
 0x25c   :  { %377 = dma.vmem_to_hbm [thread:$0]  %s375_s11, 16, %s583_s3, [#allocation4]  }
 0x25d   :  { %495 = dma.done.wait [#allocation4], 16  }
 0x25e   :  { %496 = vsyncadd [#allocation4], 4294967280 }
 0x25f   :  { %381 = vsyncpa [#allocation3], 1 }
 0x260   :  { %382 = vsyncpa [#allocation6], 1 }
 0x261   :  { %383 = vsyncpa [#allocation4], 1 }

</bundles_post_ra>
